<compile_context>
chip_gen: v7x
topology: tpu7x:2x2x1
jax: 0.10.0
libtpu: 0.0.40
codegen_flags: <defaults>
</compile_context>

<pallas_src>
import functools
import math

import jax
import jax.numpy as jnp
from jax.experimental import pallas as pl
from jax.experimental.pallas import tpu as pltpu


def _se_kernel(x_ref, w1t_ref, w2_ref, o_ref, *, inv_hw):
    """Fused SE block for one batch element.

    x_ref  : (1, C, HW)  one image, channels on sublanes, spatial on lanes
    w1t_ref: (C, Cr)     fc1 weight, transposed (Cr = C // reduction)
    w2_ref : (C, Cr)     fc2 weight (PyTorch layout)
    o_ref  : (1, C, HW)  output tile
    """
    # Single hoisted casts (no repeated broadcast/cast inside any loop).
    x = x_ref[0].astype(jnp.float32)          # (C, HW)  lane-dense
    w1t = w1t_ref[...].astype(jnp.float32)    # (C, Cr)
    w2 = w2_ref[...].astype(jnp.float32)      # (C, Cr)

    # Squeeze: global average pool over spatial dims (lane reduction, XLU).
    y = jnp.sum(x, axis=1, keepdims=True) * inv_hw            # (C, 1)

    # Excitation FC1 + ReLU:  h[j] = relu(sum_c w1[j, c] * y[c])
    # VPU broadcast-multiply + sublane reduce; tiny matvec, stays off the MXU.
    h = jnp.maximum(jnp.sum(w1t * y, axis=0, keepdims=True), 0.0)   # (1, Cr)

    # Excitation FC2 + Sigmoid:  s[i] = sigmoid(sum_j w2[i, j] * h[j])
    z = jnp.sum(w2 * h, axis=1, keepdims=True)                      # (C, 1)
    s = 1.0 / (1.0 + jnp.exp(-z))                                   # EUP exp

    # Excite: per-channel scale, broadcast across the lane (spatial) axis.
    o_ref[0] = (x * s).astype(o_ref.dtype)


def se_module(x_nchw, fc1_weight, fc2_weight):
    """Equivalent of SEModule.forward.

    x_nchw     : (N, C, H, W)
    fc1_weight : (C // reduction, C)   nn.Linear(channel, channel//reduction).weight
    fc2_weight : (C, C // reduction)   nn.Linear(channel//reduction, channel).weight
    returns    : (N, C, H, W)
    """
    N, C, H, W = x_nchw.shape
    Cr = fc1_weight.shape[0]
    HW = H * W

    # Free view: fold spatial into the lane axis (no transpose, no padding).
    x = x_nchw.reshape(N, C, HW)
    w1t = fc1_weight.T            # (C, Cr)
    w2 = fc2_weight               # (C, Cr)

    kernel = functools.partial(_se_kernel, inv_hw=1.0 / float(HW))

    out = pl.pallas_call(
        kernel,
        out_shape=jax.ShapeDtypeStruct((N, C, HW), x_nchw.dtype),
        grid=(N,),
        in_specs=[
            pl.BlockSpec((1, C, HW), lambda n: (n, 0, 0)),
            pl.BlockSpec((C, Cr), lambda n: (0, 0)),
            pl.BlockSpec((C, Cr), lambda n: (0, 0)),
        ],
        out_specs=pl.BlockSpec((1, C, HW), lambda n: (n, 0, 0)),
        # Batch axis is embarrassingly parallel -> v7x's second TensorCore
        # takes half the batch; harmless on v5e/v6e.
        compiler_params=pltpu.CompilerParams(dimension_semantics=("parallel",)),
    )(x, w1t, w2)

    return out.reshape(N, C, H, W)


if __name__ == "__main__":
    # Module config: channel = 4, reduction = 4  ->  hidden = 1.
    N, C, H, W = 2, 4, 16, 16
    reduction = 4
    Cr = C // reduction

    key = jax.random.PRNGKey(0)
    kx, k1, k2 = jax.random.split(key, 3)

    x = jax.random.normal(kx, (N, C, H, W), dtype=jnp.float32)

    # Deterministic weights matching PyTorch Linear default init bounds
    # (kaiming-uniform bound = 1/sqrt(fan_in), bias=False).
    b1 = 1.0 / math.sqrt(C)
    fc1_weight = jax.random.uniform(k1, (Cr, C), jnp.float32, -b1, b1)
    b2 = 1.0 / math.sqrt(Cr)
    fc2_weight = jax.random.uniform(k2, (C, Cr), jnp.float32, -b2, b2)

    out = jax.block_until_ready(se_module(x, fc1_weight, fc2_weight))

    # Pure-JAX reference of SEModule.forward.
    y = jnp.mean(x, axis=(2, 3))                       # (N, C)  avg_pool + view
    h = jnp.maximum(y @ fc1_weight.T, 0.0)             # (N, Cr) fc1 + ReLU
    s = jax.nn.sigmoid(h @ fc2_weight.T)               # (N, C)  fc2 + Sigmoid
    ref = x * s[:, :, None, None]                      # x * y.expand_as(x)

    assert out.shape == (N, C, H, W)
    assert jnp.allclose(out, ref, atol=1e-5, rtol=1e-5)

    print("KERNEL_OK")
</pallas_src>

<mosaic_0001>
module attributes {stable_mosaic.version = 11 : i64} {
  func.func @_se_kernel(%arg0: i32, %arg1: memref<1x4x256xf32, #tpu.memory_space<vmem>>, %arg2: memref<4x1xf32, #tpu.memory_space<vmem>>, %arg3: memref<4x1xf32, #tpu.memory_space<vmem>>, %arg4: memref<1x4x256xf32, #tpu.memory_space<vmem>>) attributes {dimension_semantics = [#tpu.dimension_semantics<parallel>], iteration_bounds = array<i64: 2>, scalar_prefetch = 0 : i64, scratch_operands = 0 : i64, tpu.core_type = #tpu.core_type<tc>, window_params = [{transform_indices = @transform_0, window_bounds = array<i64: 1, 4, 256>}, {pipeline_mode = #tpu.pipeline_mode<synchronous>, transform_indices = @transform_1, window_bounds = array<i64: 4, 1>}, {pipeline_mode = #tpu.pipeline_mode<synchronous>, transform_indices = @transform_2, window_bounds = array<i64: 4, 1>}, {transform_indices = @transform_3, window_bounds = array<i64: 1, 4, 256>}]} {
    %c0 = arith.constant 0 : index
    %c0_0 = arith.constant 0 : index
    %c0_1 = arith.constant 0 : index
    %0 = vector.load %arg1[%c0, %c0_0, %c0_1] : memref<1x4x256xf32, #tpu.memory_space<vmem>>, vector<1x4x256xf32>
    %1 = vector.shape_cast %0 : vector<1x4x256xf32> to vector<4x256xf32>
    %c0_2 = arith.constant 0 : index
    %c0_3 = arith.constant 0 : index
    %2 = vector.load %arg2[%c0_2, %c0_3] : memref<4x1xf32, #tpu.memory_space<vmem>>, vector<4x1xf32>
    %c0_4 = arith.constant 0 : index
    %c0_5 = arith.constant 0 : index
    %3 = vector.load %arg3[%c0_4, %c0_5] : memref<4x1xf32, #tpu.memory_space<vmem>>, vector<4x1xf32>
    %cst = arith.constant dense<0.000000e+00> : vector<4xf32>
    %4 = vector.multi_reduction <add>, %1, %cst [1] : vector<4x256xf32> to vector<4xf32>
    %5 = vector.shape_cast %4 : vector<4xf32> to vector<4x1xf32>
    %cst_6 = arith.constant 3.906250e-03 : f32
    %6 = vector.broadcast %cst_6 : f32 to vector<4x1xf32>
    %7 = arith.mulf %5, %6 : vector<4x1xf32>
    %8 = arith.mulf %2, %7 : vector<4x1xf32>
    %cst_7 = arith.constant dense<0.000000e+00> : vector<1xf32>
    %9 = vector.multi_reduction <add>, %8, %cst_7 [0] : vector<4x1xf32> to vector<1xf32>
    %10 = vector.shape_cast %9 : vector<1xf32> to vector<1x1xf32>
    %cst_8 = arith.constant 0.000000e+00 : f32
    %11 = vector.broadcast %cst_8 : f32 to vector<1x1xf32>
    %12 = arith.maximumf %10, %11 : vector<1x1xf32>
    %13 = vector.broadcast %12 : vector<1x1xf32> to vector<4x1xf32>
    %14 = arith.mulf %3, %13 : vector<4x1xf32>
    %cst_9 = arith.constant dense<0.000000e+00> : vector<4xf32>
    %15 = vector.multi_reduction <add>, %14, %cst_9 [1] : vector<4x1xf32> to vector<4xf32>
    %16 = vector.shape_cast %15 : vector<4xf32> to vector<4x1xf32>
    %cst_10 = arith.constant 0.000000e+00 : f32
    %17 = vector.broadcast %cst_10 : f32 to vector<4x1xf32>
    %18 = arith.subf %17, %16 : vector<4x1xf32>
    %19 = math.exp %18 : vector<4x1xf32>
    %cst_11 = arith.constant 1.000000e+00 : f32
    %20 = vector.broadcast %cst_11 : f32 to vector<4x1xf32>
    %21 = arith.addf %20, %19 : vector<4x1xf32>
    %cst_12 = arith.constant 1.000000e+00 : f32
    %22 = vector.broadcast %cst_12 : f32 to vector<4x1xf32>
    %23 = arith.divf %22, %21 : vector<4x1xf32>
    %24 = vector.broadcast %23 : vector<4x1xf32> to vector<4x256xf32>
    %25 = arith.mulf %1, %24 : vector<4x256xf32>
    %c0_13 = arith.constant 0 : index
    %c0_14 = arith.constant 0 : index
    %c0_15 = arith.constant 0 : index
    %26 = vector.load %arg4[%c0_13, %c0_14, %c0_15] : memref<1x4x256xf32, #tpu.memory_space<vmem>>, vector<1x4x256xf32>
    %27 = vector.shape_cast %26 : vector<1x4x256xf32> to vector<4x256xf32>
    %28 = vector.shape_cast %25 : vector<4x256xf32> to vector<1x4x256xf32>
    tpu.vector_store %arg4[%c0_13, %c0_14, %c0_15], %28 {strides = array<i32>} : memref<1x4x256xf32, #tpu.memory_space<vmem>>, vector<1x4x256xf32>,
    return
  }
  func.func @transform_0(%arg0: i32) -> (i32, i32, i32) {
    %c0_i32 = arith.constant 0 : i32
    %c0_i32_0 = arith.constant 0 : i32
    %c0_i32_1 = arith.constant 0 : i32
    return %arg0, %c0_i32, %c0_i32_0 : i32, i32, i32
  }
  func.func @transform_1(%arg0: i32) -> (i32, i32) {
    %c0_i32 = arith.constant 0 : i32
    %c0_i32_0 = arith.constant 0 : i32
    %c0_i32_1 = arith.constant 0 : i32
    return %c0_i32, %c0_i32_0 : i32, i32
  }
  func.func @transform_2(%arg0: i32) -> (i32, i32) {
    %c0_i32 = arith.constant 0 : i32
    %c0_i32_0 = arith.constant 0 : i32
    %c0_i32_1 = arith.constant 0 : i32
    return %c0_i32, %c0_i32_0 : i32, i32
  }
  func.func @transform_3(%arg0: i32) -> (i32, i32, i32) {
    %c0_i32 = arith.constant 0 : i32
    %c0_i32_0 = arith.constant 0 : i32
    %c0_i32_1 = arith.constant 0 : i32
    return %arg0, %c0_i32, %c0_i32_0 : i32, i32, i32
  }
}

</mosaic_0001>

<bundles_post_ra>
// kernel: tpu_custom_call.1
= control target key start
LH: loop header
LB: loop body
LE: loop exit
PB: predicated region body
PF: predicated region fallthrough
CT: control target
= control target key end

     0   :  { %8 = vsyncpa [#allocation3], 0  ;;  %s680_s0 = inlined_call_operand.hbm [shape: f32[2,4,256], index: 0, kind: input, shape index: {}]   ;;  %s681_s1 = inlined_call_operand.vmem [shape: f32[4,1], index: 1, kind: input, shape index: {}]   ;;  %s682_s2 = inlined_call_operand.vmem [shape: f32[4,1], index: 2, kind: input, shape index: {}]   ;;  %s683_s3 = inlined_call_operand.hbm [shape: f32[2,4,256], index: 3, kind: output, shape index: {}]  }
   0x1   :  { %10 = vsyncpa [#allocation3 + $0x1], 0 }
   0x2   :  { %11 = vsyncpa [#allocation4], 0 }
   0x3   :  { %13 = vsyncpa [#allocation4 + $0x1], 0  ;;  %s509_s12 = smov 0   ;;  %s511_s13 = smov 0  }
   0x4   :  { %s513_s14 = smov 0   ;;  %s515_s15 = smov 0  }
   0x5 LB: > { %s530_s16 = sadd.s32 4294967295, %s483_s15   ;;  %s317_s17 = sadd.s32 4294967294, %s483_s15   ;;  %s483_s15 = sphi %s515_s15, %s698_s15   ;;  %s479_s14 = sphi %s513_s14, %s697_s14   ;;  %s475_s13 = sphi %s511_s13, %s696_s13   ;;  %s471_s12 = sphi %s509_s12, %s695_s12  }
   0x6   : > { %s534_s18 = sadd.s32 1, %s483_s15   ;;  %s26_s19 = sadd.s32 1, %s479_s14 }
   0x7   : > { %s23_s20 = ssub.s32 %s483_s15, %s534_s18  ;;  %p33_p0 = scmp.ne.s32.totalorder %s479_s14, %s475_s13 }
   0x8   : > { %p24_p1 = scmp.eq.s32.totalorder %s23_s20, 0  ;;  %p34_p2 = scmp.eq.s32.totalorder %s483_s15, 0 }
   0x9   : > { %p39_p3 = scmp.ne.s32.totalorder %s475_s13, %s471_s12  ;;  %p40_p4 = scmp.eq.s32.totalorder %s530_s16, 0 }
   0xa   : > { %s546_s21 = scalar_select %p24_p1, %s479_s14, %s26_s19  }
   0xb   : > { %p548_p5 = por %p34_p2, %p33_p0  ;;  %p552_p6 = por %p40_p4, %p39_p3 }
   0xc   : > { %p105_p7 = scmp.eq.s32.totalorder %s530_s16, 1  ;;  %p111_p8 = scmp.eq.s32.totalorder %s317_s17, 1 }
   0xd   : > { %p345_p10 = scmp.lt.s32.totalorder %s483_s15, 2  ;;  %s137_s26 = sand.u32 1, %s479_s14  }
   0xe   : > { %p559_p11 = por %p105_p7, %p33_p0  ;;  %p563_p12 = por %p111_p8, %p39_p3 }
   0xf   : > { %s331_s27 = sshll.u32 %s483_s15, 7  ;;  %s320_s28 = sshll.u32 %s137_s26, 3 }
  0x10   : > { %s687_s24 = scalar_select %p559_p11, 1, 0 }
  0x11   : > { %s688_s25 = scalar_select %p563_p12, 1, 0 }
  0x12   : > { %s572_s4 = scalar_lea.hbm %s680_s0, %s331_s27  ;;  %s141_s5 = scalar_lea.vmem [#allocation2], %s320_s28 }
  0x13   : > { %s149_s6 = sshll.u32 %s141_s5, 4  ;;  %p576_p13 = pnand %p345_p10, %p548_p5  ;;  %s580_s6 = int_to_ptr.vmem [resolvable:$true] %s149_s6 }
  0x14   : > { %s138_s8 = scalar_lea.sflag [#allocation3], %s137_s26  ;;  %s387_s9 = scalar_lea.hbm %s572_s4, 128 }
  0x15   : > { %p388_p2 = scmp.ne.s32.totalorder %s572_s4, %s387_s9  ;;  %p389_p3 = pneg %p576_p13 }
  0x16   : > { %s392_s17 = scalar_lea.hbm %s680_s0, 256  ;;  %p393_p5 = scmp.lt.u32.totalorder %s572_s4, %s680_s0 }
  0x17   : > { %p390_p4 = pnand %p389_p3, %p388_p2  ;;  %p394_p8 = scmp.lt.u32.totalorder %s392_s17, %s387_s9 }
  0x18   : > { %p396_p9 = scmp.lt.u32.totalorder %s387_s9, %s572_s4 }
  0x19   : > { %p391_p7 = pneg %p390_p4  ;;  %p395_p10 = por %p394_p8, %p393_p5 }
  0x1b   : > { %p397_p0 = por %p396_p9, %p395_p10 }
  0x1d   : > { %p398_p1 = pnand %p397_p0, %p391_p7 }
  0x1f   : > { %401 = shalt.err (!%p398_p1)
}
  0x20   : > { %s402_s22 = scalar_lea.vmem %s580_s6, 128  ;;  %s485_s26 = smov [#allocation2]  }
  0x21   : > { %p403_p2 = scmp.ne.s32.totalorder %s580_s6, %s402_s22  ;;  %s407_s27 = sshll.u32 %s485_s26, 4  ;;  %s408_s27 = int_to_ptr.vmem [resolvable:$false] %s407_s27 }
  0x22   : > { %s409_s28 = scalar_lea.vmem %s408_s27, 256  ;;  %p410_p11 = scmp.lt.s32.totalorder %s580_s6, %s408_s27 }
  0x23   : > { %p405_p4 = pnand %p403_p2, %p389_p3  ;;  %p411_p5 = scmp.lt.s32.totalorder %s409_s28, %s402_s22 }
  0x25   : > { %p406_p12 = pneg %p405_p4  ;;  %p412_p8 = por %p411_p5, %p410_p11 }
  0x27   : > { %p413_p9 = pnand %p412_p8, %p406_p12 }
  0x29   : > { %416 = shalt.err (!%p413_p9)
}
  0x2a   : > { %340 = dma.hbm_to_vmem [thread:$0]  (!%p576_p13), %s572_s4, 128, %s580_s6, %s138_s8  }
  0x2b   : > { %p690_p0 = scmp.lt.s32.totalorder %s483_s15, 3  ;;  %p691_p1 = scmp.ge.s32.totalorder %s483_s15, 1 }
  0x2d   : > { %p155_p3 = pnand %p691_p1, %p690_p0 }
  0x2e   : > { %s614_s29 = sand.u32 (!%p155_p3), 1, %s475_s13  }
  0x2f   : > { %158 = sbr.rel (%p155_p3) target bundleno = 398 (0x18e), region = 32  ;;  %s324_s30 = sshll.u32 (!%p155_p3), %s614_s29, 3 }
  0x30   : > { %s161_s5 = scalar_lea.sflag (!%p155_p3), [#allocation3], %s614_s29  ;;  %s164_s7 = scalar_lea.vmem (!%p155_p3), [#allocation2], %s324_s30 }
  0x36   : > { %462 = dma.done.wait (%p552_p6), %s161_s5, 128  }
  0x37   : > { %464 = vsyncadd (%p552_p6), %s161_s5, 4294967168  ;;  %vm193_vm0 = vcmask 1043456   ;;  %v187_v0 = vld [vmem:[%s164_s7] sm:$0xff]  ;;  %v486_v5 = vmov 0   ;;  %vm201_vm1 = vcmask 3072   ;;  %v225_v27 = vlaneseq  ;;  %s332_s9 = sshll.u32 %s530_s16, 7 }
  0x38   : > { %v191_v1 = vcombine.high %v187_v0, %v187_v0  ;;  %v194_v2 = vsel %vm193_vm0, %v187_v0, 0.0  ;;  %381 = vset.pattern.permute.xlu0 %v486_v5  ;;  %v188_v6 = vld [vmem:[%s681_s1] sm:$0xf]  ;;  %v487_v25 = vmov 839922192   ;;  %s186_s10 = scalar_lea.vmem [#allocation5], %s324_s30  ;;  %s636_s20 = scalar_lea.hbm %s683_s3, %s332_s9 }
  0x39   : > { %v189_v17 = vld [vmem:[%s682_s2] sm:$0xf]  ;;  %v223_v26 = vunpack.c.l.s4 %v487_v25  ;;  %v226_v29 = vshrl.u32 %v225_v27, 7  ;;  %s247_s11 = sshll.u32 %s186_s10, 4  ;;  %s233_s22 = scalar_lea.sflag [#allocation4], %s614_s29  ;;  %s638_s11 = int_to_ptr.vmem [resolvable:$true] %s247_s11 }
  0x3a   : > { %v195_v3 = vsel %vm193_vm0, %v191_v1, 0.0  ;;  %s417_s26 = scalar_lea.vmem %s638_s11, 128  ;;  %p692_p11 = scmp.ne.s32.totalorder %s687_s24, 0 }
  0x3b   : > { %v196_v4 = vadd.f32 %v195_v3, %v194_v2  ;;  %v224_v28 = vunpack.c.0.s8 %v223_v26  ;;  %p418_p6 = scmp.ne.s32.totalorder %s638_s11, %s417_s26  ;;  %s488_s16 = smov [#allocation5]  }
  0x3c   : > { %s421_s27 = sshll.u32 %s488_s16, 4  ;;  %s422_s27 = int_to_ptr.vmem [resolvable:$false] %s421_s27 }
  0x3d   : > { %197 = vadd.xlane.f32.xlu0 %v196_v4  ;;  %v227_v30 = vsub.s32 %v224_v28, %v226_v29  ;;  %p419_p12 = pnand %p418_p6, %p692_p11  ;;  %s423_s28 = scalar_lea.vmem %s422_s27, 256 }
  0x3e   : > { %p424_p7 = scmp.lt.s32.totalorder %s638_s11, %s422_s27  ;;  %p425_p10 = scmp.lt.s32.totalorder %s423_s28, %s417_s26 }
  0x3f   : > { %p420_p13 = pneg %p419_p12 }
  0x40   : > { %p426_p2 = por %p425_p10, %p424_p7 }
  0x42   : > { %p427_p4 = pnand %p426_p2, %p420_p13 }
  0xca   : > { %v198_v7 = vpop.xlane.xlu0 %197 }
  0xcb   : > { %v199_v8 = vmul.f32 0.00390625, %v198_v7 }
  0xcd   : > { %v200_v9 = vmul.f32 %v199_v8, %v188_v6 }
  0xcf   : > { %v202_v10 = vsel %vm201_vm1, %v200_v9, 0.0 }
  0xd0   : > { %v203_v11 = vrot.slane %v202_v10, 4 }
  0xd2   : > { %v204_v12 = vadd.f32 %v203_v11, %v202_v10 }
  0xd4   : > { %v205_v13 = vrot.slane %v204_v12, 2 }
  0xd6   : > { %v206_v14 = vadd.f32 %v205_v13, %v204_v12 }
  0xd8   : > { %v207_v15 = vrot.slane %v206_v14, 1 }
  0xda   : > { %v208_v16 = vadd.f32 %v207_v15, %v206_v14 }
  0xdc   : > { %v209_v18 = vmax.f32 %v208_v16, 0.0 }
  0xde   : > { %v210_v19 = vmul.f32 %v209_v18, %v189_v17 }
  0xe0   : > { %v212_v20 = vsub.f32 0.0, %v210_v19 }
  0xe2   : > { %v213_v21 = vmul.f32 1.442695, %v212_v20 }
  0xe4   : > { %383 = vpow2.f32 %v213_v21 }
  0xee   : > { %v384_v22 = vpop.eup %383 }
  0xef   : > { %v215_v23 = vadd.f32 1.0, %v384_v22 }
  0xf1   : > { %385 = vrcp.f32 %v215_v23 }
  0xfb   : > { %v386_v24 = vpop.eup %385 }
  0xfc   : > { %220 = vperm.xlu0 %381, %v386_v24  }
 0x17b   : > { %v221_v31 = vpop.permute.xlu0 %220 }
 0x17c   : > { %v228_v32 = vrot.slane %v221_v31, %v227_v30 }
 0x17e   : > { %v230_v33 = vmul.f32 %v228_v32, %v187_v0 }
 0x180   : > { %231 = vst [vmem:[%s186_s10] sm:$0xff] %v230_v33 }
 0x181   : > { %430 = shalt.err (!%p427_p4)
}
 0x182   : > { %s431_s29 = scalar_lea.hbm %s636_s20, 128  ;;  %s435_s7 = scalar_lea.hbm %s683_s3, 256 }
 0x183   : > { %p432_p5 = scmp.ne.s32.totalorder %s636_s20, %s431_s29  ;;  %p436_p0 = scmp.lt.u32.totalorder %s636_s20, %s683_s3 }
 0x184   : > { %p437_p1 = scmp.lt.u32.totalorder %s435_s7, %s431_s29  ;;  %p439_p6 = scmp.lt.u32.totalorder %s431_s29, %s636_s20 }
 0x185   : > { %p433_p8 = pnand %p432_p5, %p692_p11 }
 0x186   : > { %p438_p3 = por %p437_p1, %p436_p0 }
 0x187   : > { %p434_p9 = pneg %p433_p8 }
 0x188   : > { %p440_p12 = por %p439_p6, %p438_p3 }
 0x18a   : > { %p441_p13 = pnand %p440_p12, %p434_p9 }
 0x18c   : > { %444 = shalt.err (!%p441_p13)
}
 0x18d   : > { %335 = dma.vmem_to_hbm [thread:$0]  (%p692_p11), %s638_s11, 128, %s636_s20, %s233_s22  }
 0x18e PF: > { %s259_s23 = sand.u32 1, %s471_s12   ;;  %p693_p7 = scmp.ne.s32.totalorder %s688_s25, 0 }
 0x18f   : > { %p694_p10 = scmp.ge.s32.totalorder %s483_s15, 2  ;;  %s260_s8 = scalar_lea.sflag [#allocation4], %s259_s23 }
 0x191   : > { %p342_p2 = pnand %p694_p10, %p693_p7 }
 0x193   : > { %466 = dma.done.wait (!%p342_p2), %s260_s8, 128  }
 0x194   : > { %468 = vsyncadd (!%p342_p2), %s260_s8, 4294967168  ;;  %p16_p4 = scmp.ge.s32.totalorder %s534_s18, 4   ;;  %s695_s12 = smov %s475_s13 }
 0x195   : > { %s696_s13 = smov %s479_s14  ;;  %s697_s14 = smov %s546_s21 }
 0x196   : > { %s698_s15 = smov %s534_s18  ;;  %18 = sbr.rel (!%p16_p4) target bundleno = 5 (0x5), region = 77 }
 0x19d   :  { %265 = vsyncpa [#allocation3], 1 }
 0x19e   :  { %267 = vsyncpa [#allocation3 + $0x1], 1 }
 0x19f   :  { %268 = vsyncpa [#allocation4], 1 }
 0x1a0   :  { %270 = vsyncpa [#allocation4 + $0x1], 1 }

</bundles_post_ra>
